<compile_context>
chip_gen: v6e
topology: v6e:2x2x1
jax: 0.10.0
libtpu: 0.0.40
codegen_flags: <defaults>
</compile_context>

<pallas_src>
import functools

import jax
import jax.numpy as jnp
from jax.experimental import pallas as pl
from jax.experimental.pallas import tpu as pltpu

ALPHA = 0.5
TEMPERATURE = 5.0
KL_SCALE = 0.001
IGNORE_INDEX = 255

_LANE = 128
_MAX_TILE_HW = 65536            # lane-axis (pixel) tile cap; VMEM budget decides


def _vmem_capacity_bytes():
    """Physical VMEM per TensorCore (generation aware), with a safe fallback."""
    try:
        cap = getattr(pltpu.get_tpu_info(), "vmem_capacity_bytes", None)
        if cap:
            return int(cap)
    except Exception:
        pass
    return 128 << 20


def _kd_kernel(s_ref, t_ref, tgt_ref, out_ref, *,
               inv_temperature, hw, tile_hw, ignore_index):
    """Accumulates lane-resident per-image partials over the pixel-tile grid.

    Block layout: logits (1, C, TILE_HW) — class on sublanes, pixels on lanes.
    out_ref is a (1, 1, 3, TILE_HW) per-(image, group) accumulator:
        row 0 = per-lane sum of -log p_student[target] over valid pixels
        row 1 = per-lane count of valid (non-ignored, in-range) pixels
        row 2 = per-lane sum of t_soft * (log t_soft - log s_soft)
    """
    g = pl.program_id(1)
    j = pl.program_id(2)
    tile_idx = g * pl.num_programs(2) + j

    @pl.when(j == 0)
    def _():
        out_ref[...] = jnp.zeros_like(out_ref)

    s = s_ref[0].astype(jnp.float32)   # (C, T) student logits
    t = t_ref[0].astype(jnp.float32)   # (C, T) teacher logits
    tgt = tgt_ref[0]                   # (1, T) int32 targets

    # Lane mask for the (possibly partial) last pixel tile.  Padded lanes may
    # hold garbage; everything below masks them with *selects* at (1, T).
    lane_ids = jax.lax.broadcasted_iota(jnp.int32, (1, tile_hw), 1)
    in_range = (tile_idx * tile_hw + lane_ids) < hw            # (1, T) bool

    # ---------------- Student log-softmax shift (reused twice) --------------
    s_max = jnp.max(s, axis=0, keepdims=True)                  # (1, T)
    s_shift = s - s_max                                        # (C, T)
    s_lse = jnp.log(jnp.sum(jnp.exp(s_shift), axis=0, keepdims=True))

    # ---------------- Cross entropy (ignore_index) --------------------------
    # Gather the target logit with a single select; form log-prob at (1, T).
    cls_ids = jax.lax.broadcasted_iota(jnp.int32, s.shape, 0)
    gathered = jnp.sum(jnp.where(cls_ids == tgt, s, 0.0), axis=0, keepdims=True)
    picked_logp = gathered - s_max - s_lse                     # (1, T)
    valid = jnp.logical_and(tgt != ignore_index, in_range)     # (1, T)
    ce_row = jnp.where(valid, -picked_logp, 0.0)               # select, not mul
    cnt_row = valid.astype(jnp.float32)

    # ---------------- KL(teacher || student) at temperature -----------------
    # Teacher mean-centering over classes is a softmax shift-invariance no-op,
    # so it is skipped.
    ts = t * inv_temperature
    ts_max = jnp.max(ts, axis=0, keepdims=True)
    ts_e = jnp.exp(ts - ts_max)
    ts_den = jnp.sum(ts_e, axis=0, keepdims=True)
    inv_den = pl.reciprocal(ts_den, approx=False)              # (1, T) hoisted
    t_soft = ts_e * inv_den
    t_logp = (ts - ts_max) - jnp.log(ts_den)                   # teacher log-softmax

    # Reuse the student shift: max(s / T) = max(s) / T for T > 0.
    ss_shift = s_shift * inv_temperature
    ss_lse = jnp.log(jnp.sum(jnp.exp(ss_shift), axis=0, keepdims=True))
    # sum_c t_soft * (t_logp - (ss_shift - ss_lse))
    #   = sum_c t_soft * (t_logp - ss_shift) + ss_lse        (sum_c t_soft = 1)
    kl_col = jnp.sum(t_soft * (t_logp - ss_shift), axis=0, keepdims=True) + ss_lse
    kl_row = jnp.where(in_range, kl_col, 0.0)                  # select, not mul

    # Lane-resident accumulation: plain row writes, no cross-lane reduce here.
    out_ref[0, 0, 0:1, :] += ce_row
    out_ref[0, 0, 1:2, :] += cnt_row
    out_ref[0, 0, 2:3, :] += kl_row


def knowledge_distillation_loss(student_logits, teacher_logits, targets,
                                alpha=ALPHA, temperature=TEMPERATURE,
                                kl_scale=KL_SCALE, *, tile_hw_override=None):
    """Matches KnowledgeDistillationLoss.forward for NCHW logits."""
    N, C, H, W = student_logits.shape
    HW = H * W

    # Free reshapes only (no transpose / padding of the big logit tensors).
    s3 = student_logits.reshape(N, C, HW)
    t3 = teacher_logits.reshape(N, C, HW)
    tg3 = targets.reshape(N, 1, HW).astype(jnp.int32)

    # Generation-aware VMEM budgets: stay well under v7x's 64 MiB per core,
    # use most of v5e/v6e's 128 MiB.
    vmem_cap = _vmem_capacity_bytes()
    if vmem_cap <= (64 << 20):            # v7x-class part
        vmem_limit = 48 << 20
        input_budget = 14 << 20
    else:                                 # v5e / v6e (128 MiB physical)
        vmem_limit = 104 << 20
        input_budget = 48 << 20

    itemsize = max(jnp.dtype(s3.dtype).itemsize, jnp.dtype(t3.dtype).itemsize)
    # Per-pixel VMEM bytes: 2 logit inputs x 2 pipeline buffers, the int32
    # target block (x2), ~10 live (C, T) f32 temporaries, and the resident
    # (3, T) f32 accumulator (x2).
    bytes_per_px = 4 * C * itemsize + 2 * 4 + 10 * C * 4 + 2 * 3 * 4

    if tile_hw_override is not None:
        tile_hw = int(tile_hw_override)
        total_tiles = -(-HW // tile_hw)
    else:
        budget_tile = max(_LANE,
                          (input_budget // bytes_per_px) // _LANE * _LANE)
        max_tile = min(_MAX_TILE_HW, budget_tile)
        if HW <= max_tile:
            tile_hw = HW            # full lane extent — always a legal block dim
            total_tiles = 1
        else:
            tile_hw = max_tile      # multiple of 128; tail masked in-kernel
            total_tiles = -(-HW // tile_hw)

    # Extra "parallel" group axis over pixel tiles so v7x's two TensorCores
    # both get work when N is 1 / odd.  Groups only split evenly (no phantom
    # out-of-range tiles), so no reliance on out-of-bounds block semantics.
    if N % 2 == 1 and total_tiles >= 2 and total_tiles % 2 == 0:
        num_groups = 2
    else:
        num_groups = 1
    tiles_per_group = total_tiles // num_groups

    kernel = functools.partial(
        _kd_kernel,
        inv_temperature=1.0 / float(temperature),
        hw=HW, tile_hw=tile_hw, ignore_index=IGNORE_INDEX)

    def _logit_map(n, g, j):
        return (n, 0, g * tiles_per_group + j)

    def _tgt_map(n, g, j):
        return (n, 0, g * tiles_per_group + j)

    def _out_map(n, g, j):
        return (n, g, 0, 0)

    cost = pl.CostEstimate(
        flops=int(26 * N * C * HW),
        transcendentals=int(3 * N * C * HW + 4 * N * HW),
        bytes_accessed=int(s3.size * itemsize + t3.size * itemsize
                           + tg3.size * 4
                           + N * num_groups * 3 * tile_hw * 4))

    partials = pl.pallas_call(
        kernel,
        out_shape=jax.ShapeDtypeStruct((N, num_groups, 3, tile_hw), jnp.float32),
        grid=(N, num_groups, tiles_per_group),
        in_specs=[
            pl.BlockSpec((1, C, tile_hw), _logit_map),
            pl.BlockSpec((1, C, tile_hw), _logit_map),
            pl.BlockSpec((1, 1, tile_hw), _tgt_map),
        ],
        out_specs=pl.BlockSpec((1, 1, 3, tile_hw), _out_map),
        compiler_params=pltpu.CompilerParams(
            dimension_semantics=("parallel", "parallel", "arbitrary"),
            vmem_limit_bytes=vmem_limit),
        cost_estimate=cost,
    )(s3, t3, tg3)

    # Single small cross-lane reduction in the wrapper.
    ce_sum = jnp.sum(partials[:, :, 0, :])
    ce_cnt = jnp.sum(partials[:, :, 1, :])
    kl_sum = jnp.sum(partials[:, :, 2, :])

    ce_loss = ce_sum / jnp.maximum(ce_cnt, 1.0)
    # KLDivLoss(reduction='batchmean') divides by the batch size N.
    kl_loss = (kl_sum / N) * (float(temperature) ** 2)
    total_loss = (1.0 - alpha) * ce_loss + alpha * kl_loss * kl_scale
    return total_loss, ce_loss, kl_loss


def _reference(student_logits, teacher_logits, targets,
               alpha=ALPHA, temperature=TEMPERATURE, kl_scale=KL_SCALE):
    """Pure-JAX reference mirroring the PyTorch module."""
    N, C, H, W = student_logits.shape
    t = teacher_logits - jnp.mean(teacher_logits, axis=1, keepdims=True)

    logp = jax.nn.log_softmax(student_logits, axis=1)            # (N,C,H,W)
    valid = (targets != IGNORE_INDEX)
    safe_tgt = jnp.where(valid, targets, 0).astype(jnp.int32)
    picked = jnp.take_along_axis(logp, safe_tgt[:, None], axis=1)[:, 0]
    ce = jnp.sum(jnp.where(valid, -picked, 0.0)) / jnp.maximum(
        jnp.sum(valid.astype(jnp.float32)), 1.0)

    t_soft = jax.nn.softmax(t / temperature, axis=1)
    s_soft = jax.nn.log_softmax(student_logits / temperature, axis=1)
    kl = jnp.sum(t_soft * (jnp.log(t_soft) - s_soft)) / N * temperature ** 2
    total = (1.0 - alpha) * ce + alpha * kl * kl_scale
    return total, ce, kl


def _check(student, teacher, targets, **kwargs):
    got = knowledge_distillation_loss(student, teacher, targets, **kwargs)
    jax.block_until_ready(got)
    want = _reference(student, teacher, targets)
    for g, w in zip(got, want):
        assert jnp.allclose(g, w, atol=1e-4, rtol=1e-4), (g, w)


if __name__ == "__main__":
    key = jax.random.PRNGKey(0)
    k1, k2, k3 = jax.random.split(key, 3)

    # Test 1: default tiling (single full-width pixel tile per image).
    N, C, H, W = 2, 8, 16, 16
    student = jax.random.normal(k1, (N, C, H, W), dtype=jnp.float32)
    teacher = jax.random.normal(k2, (N, C, H, W), dtype=jnp.float32) * 2.0
    targets = jax.random.randint(k3, (N, H, W), 0, C).astype(jnp.int32)
    targets = targets.at[0, 0, :4].set(IGNORE_INDEX)
    targets = targets.at[1, 3, 5].set(IGNORE_INDEX)
    _check(student, teacher, targets)

    # Test 2: forced small tile with a partial tail tile (HW % tile != 0),
    # exercising the padded-lane select masking on real hardware.
    k4, k5, k6 = jax.random.split(jax.random.PRNGKey(1), 3)
    N2, H2, W2 = 1, 18, 18
    s2 = jax.random.normal(k4, (N2, C, H2, W2), dtype=jnp.float32)
    t2 = jax.random.normal(k5, (N2, C, H2, W2), dtype=jnp.float32) * 2.0
    tg2 = jax.random.randint(k6, (N2, H2, W2), 0, C).astype(jnp.int32)
    tg2 = tg2.at[0, 2, :3].set(IGNORE_INDEX)
    _check(s2, t2, tg2, tile_hw_override=128)

    # Test 3: N odd + even tile count -> exercises the 2-group grid split
    # (the v7x dual-TensorCore path); numerically identical everywhere.
    k7, k8, k9 = jax.random.split(jax.random.PRNGKey(2), 3)
    s3_ = jax.random.normal(k7, (1, C, 16, 16), dtype=jnp.float32)
    t3_ = jax.random.normal(k8, (1, C, 16, 16), dtype=jnp.float32) * 2.0
    tg3_ = jax.random.randint(k9, (1, 16, 16), 0, C).astype(jnp.int32)
    tg3_ = tg3_.at[0, 7, 7].set(IGNORE_INDEX)
    _check(s3_, t3_, tg3_, tile_hw_override=128)

    print("KERNEL_OK")
</pallas_src>

<mosaic_0001>
module attributes {stable_mosaic.version = 11 : i64} {
  func.func @_kd_kernel(%arg0: i32, %arg1: i32, %arg2: i32, %arg3: memref<1x8x256xf32, #tpu.memory_space<vmem>>, %arg4: memref<1x8x256xf32, #tpu.memory_space<vmem>>, %arg5: memref<1x1x256xi32, #tpu.memory_space<vmem>>, %arg6: memref<1x1x3x256xf32, #tpu.memory_space<vmem>>) attributes {dimension_semantics = [#tpu.dimension_semantics<parallel>, #tpu.dimension_semantics<parallel>, #tpu.dimension_semantics<arbitrary>], iteration_bounds = array<i64: 2, 1, 1>, scalar_prefetch = 0 : i64, scratch_operands = 0 : i64, tpu.core_type = #tpu.core_type<tc>, window_params = [{transform_indices = @transform_0, window_bounds = array<i64: 1, 8, 256>}, {transform_indices = @transform_1, window_bounds = array<i64: 1, 8, 256>}, {transform_indices = @transform_2, window_bounds = array<i64: 1, 1, 256>}, {transform_indices = @transform_3, window_bounds = array<i64: 1, 1, 3, 256>}]} {
    %c1_i32 = arith.constant 1 : i32
    %0 = arith.muli %arg1, %c1_i32 : i32
    %1 = arith.addi %0, %arg2 : i32
    %c0_i32 = arith.constant 0 : i32
    %2 = arith.cmpi eq, %arg2, %c0_i32 : i32
    %3 = arith.extui %2 : i1 to i32
    %c0_i32_0 = arith.constant 0 : i32
    %4 = arith.cmpi ne, %3, %c0_i32_0 : i32
    scf.if %4 {
      %cst_44 = arith.constant 0.000000e+00 : f32
      %91 = vector.broadcast %cst_44 : f32 to vector<1x1x3x256xf32>
      %c0_45 = arith.constant 0 : index
      %c0_46 = arith.constant 0 : index
      %c0_47 = arith.constant 0 : index
      %c0_48 = arith.constant 0 : index
      %92 = vector.load %arg6[%c0_45, %c0_46, %c0_47, %c0_48] : memref<1x1x3x256xf32, #tpu.memory_space<vmem>>, vector<1x1x3x256xf32>
      tpu.vector_store %arg6[%c0_45, %c0_46, %c0_47, %c0_48], %91 {strides = array<i32>} : memref<1x1x3x256xf32, #tpu.memory_space<vmem>>, vector<1x1x3x256xf32>,
    } else {
    }
    %c0 = arith.constant 0 : index
    %c0_1 = arith.constant 0 : index
    %c0_2 = arith.constant 0 : index
    %5 = vector.load %arg3[%c0, %c0_1, %c0_2] : memref<1x8x256xf32, #tpu.memory_space<vmem>>, vector<1x8x256xf32>
    %6 = vector.shape_cast %5 : vector<1x8x256xf32> to vector<8x256xf32>
    %c0_3 = arith.constant 0 : index
    %c0_4 = arith.constant 0 : index
    %c0_5 = arith.constant 0 : index
    %7 = vector.load %arg4[%c0_3, %c0_4, %c0_5] : memref<1x8x256xf32, #tpu.memory_space<vmem>>, vector<1x8x256xf32>
    %8 = vector.shape_cast %7 : vector<1x8x256xf32> to vector<8x256xf32>
    %c0_6 = arith.constant 0 : index
    %c0_7 = arith.constant 0 : index
    %c0_8 = arith.constant 0 : index
    %9 = vector.load %arg5[%c0_6, %c0_7, %c0_8] : memref<1x1x256xi32, #tpu.memory_space<vmem>>, vector<1x1x256xi32>
    %10 = vector.shape_cast %9 : vector<1x1x256xi32> to vector<1x256xi32>
    %11 = tpu.iota {dimensions = array<i32: 1>} : vector<1x256xi32>
    %c256_i32 = arith.constant 256 : i32
    %12 = arith.muli %1, %c256_i32 : i32
    %13 = vector.broadcast %12 : i32 to vector<1x256xi32>
    %14 = arith.addi %13, %11 : vector<1x256xi32>
    %c256_i32_9 = arith.constant 256 : i32
    %15 = vector.broadcast %c256_i32_9 : i32 to vector<1x256xi32>
    %16 = arith.cmpi slt, %14, %15 : vector<1x256xi32>
    %cst = arith.constant dense<0xFF800000> : vector<256xf32>
    %17 = vector.multi_reduction <maximumf>, %6, %cst [0] : vector<8x256xf32> to vector<256xf32>
    %18 = vector.shape_cast %17 : vector<256xf32> to vector<1x256xf32>
    %19 = vector.broadcast %18 : vector<1x256xf32> to vector<8x256xf32>
    %20 = arith.subf %6, %19 : vector<8x256xf32>
    %21 = math.exp %20 : vector<8x256xf32>
    %cst_10 = arith.constant dense<0.000000e+00> : vector<256xf32>
    %22 = vector.multi_reduction <add>, %21, %cst_10 [0] : vector<8x256xf32> to vector<256xf32>
    %23 = vector.shape_cast %22 : vector<256xf32> to vector<1x256xf32>
    %24 = math.log %23 : vector<1x256xf32>
    %25 = tpu.iota {dimensions = array<i32: 0>} : vector<8x256xi32>
    %26 = vector.broadcast %10 : vector<1x256xi32> to vector<8x256xi32>
    %27 = arith.cmpi eq, %25, %26 : vector<8x256xi32>
    %cst_11 = arith.constant 0.000000e+00 : f32
    %28 = vector.broadcast %cst_11 : f32 to vector<8x256xf32>
    %29 = arith.select %27, %6, %28 : vector<8x256xi1>, vector<8x256xf32>
    %cst_12 = arith.constant dense<0.000000e+00> : vector<256xf32>
    %30 = vector.multi_reduction <add>, %29, %cst_12 [0] : vector<8x256xf32> to vector<256xf32>
    %31 = vector.shape_cast %30 : vector<256xf32> to vector<1x256xf32>
    %32 = arith.subf %31, %18 : vector<1x256xf32>
    %33 = arith.subf %32, %24 : vector<1x256xf32>
    %c255_i32 = arith.constant 255 : i32
    %34 = vector.broadcast %c255_i32 : i32 to vector<1x256xi32>
    %35 = arith.cmpi ne, %10, %34 : vector<1x256xi32>
    %36 = arith.andi %35, %16 : vector<1x256xi1>
    %cst_13 = arith.constant 0.000000e+00 : f32
    %37 = vector.broadcast %cst_13 : f32 to vector<1x256xf32>
    %38 = arith.subf %37, %33 : vector<1x256xf32>
    %cst_14 = arith.constant 0.000000e+00 : f32
    %39 = vector.broadcast %cst_14 : f32 to vector<1x256xf32>
    %40 = arith.select %36, %38, %39 : vector<1x256xi1>, vector<1x256xf32>
    %41 = arith.extui %36 : vector<1x256xi1> to vector<1x256xi32>
    %42 = arith.sitofp %41 : vector<1x256xi32> to vector<1x256xf32>
    %cst_15 = arith.constant 2.000000e-01 : f32
    %43 = vector.broadcast %cst_15 : f32 to vector<8x256xf32>
    %44 = arith.mulf %8, %43 : vector<8x256xf32>
    %cst_16 = arith.constant dense<0xFF800000> : vector<256xf32>
    %45 = vector.multi_reduction <maximumf>, %44, %cst_16 [0] : vector<8x256xf32> to vector<256xf32>
    %46 = vector.shape_cast %45 : vector<256xf32> to vector<1x256xf32>
    %47 = vector.broadcast %46 : vector<1x256xf32> to vector<8x256xf32>
    %48 = arith.subf %44, %47 : vector<8x256xf32>
    %49 = math.exp %48 : vector<8x256xf32>
    %cst_17 = arith.constant dense<0.000000e+00> : vector<256xf32>
    %50 = vector.multi_reduction <add>, %49, %cst_17 [0] : vector<8x256xf32> to vector<256xf32>
    %51 = vector.shape_cast %50 : vector<256xf32> to vector<1x256xf32>
    %52 = tpu.reciprocal %51 : vector<1x256xf32> -> vector<1x256xf32>
    %53 = vector.broadcast %52 : vector<1x256xf32> to vector<8x256xf32>
    %54 = arith.mulf %49, %53 : vector<8x256xf32>
    %55 = vector.broadcast %46 : vector<1x256xf32> to vector<8x256xf32>
    %56 = arith.subf %44, %55 : vector<8x256xf32>
    %57 = math.log %51 : vector<1x256xf32>
    %58 = vector.broadcast %57 : vector<1x256xf32> to vector<8x256xf32>
    %59 = arith.subf %56, %58 : vector<8x256xf32>
    %cst_18 = arith.constant 2.000000e-01 : f32
    %60 = vector.broadcast %cst_18 : f32 to vector<8x256xf32>
    %61 = arith.mulf %20, %60 : vector<8x256xf32>
    %62 = math.exp %61 : vector<8x256xf32>
    %cst_19 = arith.constant dense<0.000000e+00> : vector<256xf32>
    %63 = vector.multi_reduction <add>, %62, %cst_19 [0] : vector<8x256xf32> to vector<256xf32>
    %64 = vector.shape_cast %63 : vector<256xf32> to vector<1x256xf32>
    %65 = math.log %64 : vector<1x256xf32>
    %66 = arith.subf %59, %61 : vector<8x256xf32>
    %67 = arith.mulf %54, %66 : vector<8x256xf32>
    %cst_20 = arith.constant dense<0.000000e+00> : vector<256xf32>
    %68 = vector.multi_reduction <add>, %67, %cst_20 [0] : vector<8x256xf32> to vector<256xf32>
    %69 = vector.shape_cast %68 : vector<256xf32> to vector<1x256xf32>
    %70 = arith.addf %69, %65 : vector<1x256xf32>
    %cst_21 = arith.constant 0.000000e+00 : f32
    %71 = vector.broadcast %cst_21 : f32 to vector<1x256xf32>
    %72 = arith.select %16, %70, %71 : vector<1x256xi1>, vector<1x256xf32>
    %c0_22 = arith.constant 0 : index
    %c0_23 = arith.constant 0 : index
    %c0_24 = arith.constant 0 : index
    %c0_25 = arith.constant 0 : index
    %73 = vector.load %arg6[%c0_22, %c0_23, %c0_24, %c0_25] : memref<1x1x3x256xf32, #tpu.memory_space<vmem>>, vector<1x1x1x256xf32>
    %74 = vector.shape_cast %73 : vector<1x1x1x256xf32> to vector<1x256xf32>
    %75 = arith.addf %74, %40 : vector<1x256xf32>
    %c0_26 = arith.constant 0 : index
    %c0_27 = arith.constant 0 : index
    %c0_28 = arith.constant 0 : index
    %c0_29 = arith.constant 0 : index
    %76 = vector.load %arg6[%c0_26, %c0_27, %c0_28, %c0_29] : memref<1x1x3x256xf32, #tpu.memory_space<vmem>>, vector<1x1x1x256xf32>
    %77 = vector.shape_cast %76 : vector<1x1x1x256xf32> to vector<1x256xf32>
    %78 = vector.shape_cast %75 : vector<1x256xf32> to vector<1x1x1x256xf32>
    tpu.vector_store %arg6[%c0_26, %c0_27, %c0_28, %c0_29], %78 {strides = array<i32>} : memref<1x1x3x256xf32, #tpu.memory_space<vmem>>, vector<1x1x1x256xf32>,
    %c0_30 = arith.constant 0 : index
    %c0_31 = arith.constant 0 : index
    %c1 = arith.constant 1 : index
    %c0_32 = arith.constant 0 : index
    %79 = vector.load %arg6[%c0_30, %c0_31, %c1, %c0_32] : memref<1x1x3x256xf32, #tpu.memory_space<vmem>>, vector<1x1x1x256xf32>
    %80 = vector.shape_cast %79 : vector<1x1x1x256xf32> to vector<1x256xf32>
    %81 = arith.addf %80, %42 : vector<1x256xf32>
    %c0_33 = arith.constant 0 : index
    %c0_34 = arith.constant 0 : index
    %c1_35 = arith.constant 1 : index
    %c0_36 = arith.constant 0 : index
    %82 = vector.load %arg6[%c0_33, %c0_34, %c1_35, %c0_36] : memref<1x1x3x256xf32, #tpu.memory_space<vmem>>, vector<1x1x1x256xf32>
    %83 = vector.shape_cast %82 : vector<1x1x1x256xf32> to vector<1x256xf32>
    %84 = vector.shape_cast %81 : vector<1x256xf32> to vector<1x1x1x256xf32>
    tpu.vector_store %arg6[%c0_33, %c0_34, %c1_35, %c0_36], %84 {strides = array<i32>} : memref<1x1x3x256xf32, #tpu.memory_space<vmem>>, vector<1x1x1x256xf32>,
    %c0_37 = arith.constant 0 : index
    %c0_38 = arith.constant 0 : index
    %c2 = arith.constant 2 : index
    %c0_39 = arith.constant 0 : index
    %85 = vector.load %arg6[%c0_37, %c0_38, %c2, %c0_39] : memref<1x1x3x256xf32, #tpu.memory_space<vmem>>, vector<1x1x1x256xf32>
    %86 = vector.shape_cast %85 : vector<1x1x1x256xf32> to vector<1x256xf32>
    %87 = arith.addf %86, %72 : vector<1x256xf32>
    %c0_40 = arith.constant 0 : index
    %c0_41 = arith.constant 0 : index
    %c2_42 = arith.constant 2 : index
    %c0_43 = arith.constant 0 : index
    %88 = vector.load %arg6[%c0_40, %c0_41, %c2_42, %c0_43] : memref<1x1x3x256xf32, #tpu.memory_space<vmem>>, vector<1x1x1x256xf32>
    %89 = vector.shape_cast %88 : vector<1x1x1x256xf32> to vector<1x256xf32>
    %90 = vector.shape_cast %87 : vector<1x256xf32> to vector<1x1x1x256xf32>
    tpu.vector_store %arg6[%c0_40, %c0_41, %c2_42, %c0_43], %90 {strides = array<i32>} : memref<1x1x3x256xf32, #tpu.memory_space<vmem>>, vector<1x1x1x256xf32>,
    return
  }
  func.func @transform_0(%arg0: i32, %arg1: i32, %arg2: i32) -> (i32, i32, i32) {
    %c1_i32 = arith.constant 1 : i32
    %0 = arith.muli %arg1, %c1_i32 : i32
    %1 = arith.addi %0, %arg2 : i32
    %c0_i32 = arith.constant 0 : i32
    %c0_i32_0 = arith.constant 0 : i32
    return %arg0, %c0_i32, %1 : i32, i32, i32
  }
  func.func @transform_1(%arg0: i32, %arg1: i32, %arg2: i32) -> (i32, i32, i32) {
    %c1_i32 = arith.constant 1 : i32
    %0 = arith.muli %arg1, %c1_i32 : i32
    %1 = arith.addi %0, %arg2 : i32
    %c0_i32 = arith.constant 0 : i32
    %c0_i32_0 = arith.constant 0 : i32
    return %arg0, %c0_i32, %1 : i32, i32, i32
  }
  func.func @transform_2(%arg0: i32, %arg1: i32, %arg2: i32) -> (i32, i32, i32) {
    %c1_i32 = arith.constant 1 : i32
    %0 = arith.muli %arg1, %c1_i32 : i32
    %1 = arith.addi %0, %arg2 : i32
    %c0_i32 = arith.constant 0 : i32
    %c0_i32_0 = arith.constant 0 : i32
    return %arg0, %c0_i32, %1 : i32, i32, i32
  }
  func.func @transform_3(%arg0: i32, %arg1: i32, %arg2: i32) -> (i32, i32, i32, i32) {
    %c0_i32 = arith.constant 0 : i32
    %c0_i32_0 = arith.constant 0 : i32
    %c0_i32_1 = arith.constant 0 : i32
    return %arg0, %arg1, %c0_i32, %c0_i32_0 : i32, i32, i32, i32
  }
}

</mosaic_0001>

<bundles_post_ra>
// kernel: tpu_custom_call.1
= control target key start
LH: loop header
LB: loop body
LE: loop exit
PB: predicated region body
PF: predicated region fallthrough
CT: control target
= control target key end

     0   :  { %8 = vsyncpa [#allocation3], 0  ;;  %s1236_s0 = inlined_call_operand.hbm [shape: f32[2,8,256], index: 0, kind: input, shape index: {}]   ;;  %s1237_s1 = inlined_call_operand.hbm [shape: f32[2,8,256], index: 1, kind: input, shape index: {}]   ;;  %s1238_s2 = inlined_call_operand.hbm [shape: s32[2,1,256], index: 2, kind: input, shape index: {}]   ;;  %s1239_s3 = inlined_call_operand.vmem [shape: f32[2,1,3,256], index: 3, kind: output, shape index: {}]  }
   0x1   :  { %10 = vsyncpa [#allocation3 + $0x1], 0 }
   0x2   :  { %11 = vsyncpa [#allocation5], 0 }
   0x3   :  { %13 = vsyncpa [#allocation5 + $0x1], 0  ;;  %s1007_s12 = smov 0   ;;  %s1009_s13 = smov 0  }
   0x4   :  { %s1011_s14 = smov 0   ;;  %s1013_s15 = smov 0  }
   0x5   :  { %s1015_s16 = smov 0   ;;  %s1017_s17 = smov 0  }
   0x6 LB: > { %s715_s18 = sadd.s32 4294967295, %s979_s17   ;;  %s38_s19 = sadd.s32 1, %s975_s16  ;;  %s979_s17 = sphi %s1017_s17, %s19_s17   ;;  %s975_s16 = sphi %s1015_s16, %s1251_s16   ;;  %s971_s15 = sphi %s1013_s15, %s1250_s15   ;;  %s967_s14 = sphi %s1011_s14, %s1249_s14   ;;  %s963_s13 = sphi %s1009_s13, %s1248_s13   ;;  %s959_s12 = sphi %s1007_s12, %s1247_s12  }
   0x7   : > { %p40_p0 = scmp.ge.s32.totalorder %s38_s19, 2  ;;  %s49_s20 = sadd.s32 1, %s967_s14 }
   0x8   : > { %p56_p1 = scmp.ne.s32.totalorder %s967_s14, %s963_s13  ;;  %p57_p2 = scmp.eq.s32.totalorder %s979_s17, 0 }
   0x9   : > { %s1253_s19 = smov (%p40_p0, %s38_s19), 0  ;;  %p62_p4 = scmp.ne.s32.totalorder %s963_s13, %s959_s12 }
   0xa   : > { %p58_p3 = por %p57_p2, %p56_p1  ;;  %s44_s21 = ssub.s32 %s975_s16, %s1253_s19 }
   0xb   : > { %p63_p5 = scmp.eq.s32.totalorder %s715_s18, 0  ;;  %p47_p6 = scmp.eq.s32.totalorder %s44_s21, 0 }
   0xc   : > { %p761_p8 = scmp.lt.s32.totalorder %s979_s17, 2  ;;  %s1057_s24 = sand.u32 1, %s967_s14  }
   0xd   : > { %p1048_p7 = por %p63_p5, %p62_p4  ;;  %s741_s25 = sshll.u32 %s975_s16, 8 }
   0xe   : > { %s1054_s23 = scalar_select %p47_p6, %s967_s14, %s49_s20  }
   0xf   : > { %s719_s26 = sshll.u32 %s1057_s24, 4  ;;  %p1061_p9 = pnand %p761_p8, %p58_p3 }
  0x10   : > { %s196_s28 = sand.u32 1, %s979_s17   ;;  %s209_s4 = scalar_lea.hbm %s1237_s1, %s741_s25 }
  0x11   : > { %s200_s5 = scalar_lea.vmem [#allocation4], %s719_s26  ;;  %p728_p10 = scmp.ge.s32.totalorder %s979_s17, 1 }
  0x12   : > { %s211_s6 = sshll.u32 %s200_s5, 4  ;;  %s1070_s7 = scalar_lea.sflag [#allocation5], %s196_s28  ;;  %s212_s6 = int_to_ptr.vmem [resolvable:$true] %s211_s6 }
  0x13   : > { %p843_p11 = pneg %p1061_p9  ;;  %s854_s8 = scalar_lea.vmem %s212_s6, 256 }
  0x14   : > { %p855_p12 = scmp.ne.s32.totalorder %s212_s6, %s854_s8  ;;  %s981_s9 = smov [#allocation4]  }
  0x15   : > { %s859_s10 = sshll.u32 %s981_s9, 4  ;;  %s860_s10 = int_to_ptr.vmem [resolvable:$false] %s859_s10 }
  0x16   : > { %p857_p13 = pnand %p855_p12, %p843_p11  ;;  %s861_s11 = scalar_lea.vmem %s860_s10, 512 }
  0x17   : > { %p862_p1 = scmp.lt.s32.totalorder %s212_s6, %s860_s10  ;;  %p863_p2 = scmp.lt.s32.totalorder %s861_s11, %s854_s8 }
  0x18   : > { %p858_p0 = pneg %p857_p13 }
  0x19   : > { %p864_p3 = por %p863_p2, %p862_p1 }
  0x1b   : > { %p865_p4 = pnand %p864_p3, %p858_p0 }
  0x1d   : > { %868 = shalt.err (!%p865_p4)
}
  0x1e   : > { %757 = dma.hbm_to_vmem [thread:$0]  (!%p1061_p9), %s209_s4, 256, %s212_s6, %s1070_s7  }
  0x1f   : > { %p238_p5 = scmp.lt.s32.totalorder %s979_s17, 3  ;;  %s187_s28 = scalar_lea.hbm %s1236_s0, %s741_s25 }
  0x20   : > { %s178_s29 = scalar_lea.vmem [#allocation2], %s719_s26  ;;  %s725_s5 = sshll.u32 %s1057_s24, 1 }
  0x21   : > { %p1083_p6 = pnand %p728_p10, %p238_p5  ;;  %s189_s30 = sshll.u32 %s178_s29, 4  ;;  %s190_s30 = int_to_ptr.vmem [resolvable:$true] %s189_s30 }
  0x22   : > { %s175_s8 = scalar_lea.sflag [#allocation3], %s1057_s24  ;;  %s882_s9 = scalar_lea.vmem %s190_s30, 256 }
  0x23   : > { %p883_p8 = scmp.ne.s32.totalorder %s190_s30, %s882_s9  ;;  %s982_s4 = smov [#allocation2]  }
  0x24   : > { %s887_s6 = sshll.u32 %s982_s4, 4  ;;  %s888_s6 = int_to_ptr.vmem [resolvable:$false] %s887_s6 }
  0x25   : > { %p885_p12 = pnand %p883_p8, %p843_p11  ;;  %s889_s10 = scalar_lea.vmem %s888_s6, 512 }
  0x26   : > { %p890_p10 = scmp.lt.s32.totalorder %s190_s30, %s888_s6  ;;  %p891_p0 = scmp.lt.s32.totalorder %s889_s10, %s882_s9 }
  0x27   : > { %p886_p13 = pneg %p885_p12 }
  0x28   : > { %p892_p1 = por %p891_p0, %p890_p10 }
  0x2a   : > { %p893_p2 = pnand %p892_p1, %p886_p13 }
  0x2c   : > { %896 = shalt.err (!%p893_p2)
}
  0x2d   : > { %754 = dma.hbm_to_vmem [thread:$0]  (!%p1061_p9), %s187_s28, 256, %s190_s30, %s175_s8  }
  0x2e   : > { %s743_s24 = sshll.u32 %s975_s16, 5  ;;  %s222_s20 = scalar_lea.vmem [#allocation6], %s725_s5 }
  0x2f   : > { %s231_s11 = scalar_lea.hbm %s1238_s2, %s743_s24  ;;  %s233_s21 = sshll.u32 %s222_s20, 4  ;;  %s234_s21 = int_to_ptr.vmem [resolvable:$true] %s233_s21 }
  0x30   : > { %s910_s29 = scalar_lea.vmem %s234_s21, 32  ;;  %s983_s9 = smov [#allocation6]  }
  0x31   : > { %p911_p3 = scmp.ne.s32.totalorder %s234_s21, %s910_s29  ;;  %s915_s4 = sshll.u32 %s983_s9, 4  ;;  %s916_s4 = int_to_ptr.vmem [resolvable:$false] %s915_s4 }
  0x32   : > { %s917_s6 = scalar_lea.vmem %s916_s4, 64  ;;  %p918_p8 = scmp.lt.s32.totalorder %s234_s21, %s916_s4 }
  0x33   : > { %p913_p4 = pnand %p911_p3, %p843_p11  ;;  %p919_p12 = scmp.lt.s32.totalorder %s917_s6, %s910_s29 }
  0x35   : > { %p914_p5 = pneg %p913_p4  ;;  %p920_p13 = por %p919_p12, %p918_p8 }
  0x37   : > { %p921_p10 = pnand %p920_p13, %p914_p5 }
  0x39   : > { %924 = shalt.err (!%p921_p10)
}
  0x3a   : > { %760 = dma.hbm_to_vmem [thread:$0]  (!%p1061_p9), %s231_s11, 32, %s234_s21, %s1070_s7  }
  0x3b   : > { %242 = sbr.rel (%p1083_p6) target bundleno = 163 (0xa3), region = 32  ;;  %s1110_s28 = sand.u32 (!%p1083_p6), 1, %s963_s13  }
  0x3c   : > { %s729_s30 = sshll.u32 (!%p1083_p6), %s1110_s28, 4  ;;  %s245_s5 = scalar_lea.sflag (!%p1083_p6), [#allocation3], %s1110_s28 }
  0x3d   : > { %s248_s8 = scalar_lea.vmem (!%p1083_p6), [#allocation2], %s729_s30 }
  0x40   : > { %950 = dma.done.wait (%p1048_p7), %s245_s5, 256  }
  0x41   : > { %952 = vsyncadd (%p1048_p7), %s245_s5, 4294967040  ;;  %s253_s27 = sand.u32 1, %s715_s18   ;;  %s257_s12 = scalar_lea.vmem [#allocation4], %s729_s30 }
  0x42   : > { %s254_s7 = scalar_lea.sflag [#allocation5], %s253_s27 }
  0x43   : > { %954 = dma.done.wait (%p1048_p7), %s254_s7, 288  }
  0x44   : > { %956 = vsyncadd (%p1048_p7), %s254_s7, 4294967008  ;;  %p309_p9 = scmp.lt.s32.totalorder %s971_s15, 1  ;;  %v372_v0 = vlaneseq  ;;  %v984_v1 = vmov 1966171168   ;;  %s731_s10 = sshll.u32 %s1110_s28, 1  ;;  %v985_v4 = vmov 1  }
  0x45   : > { %v407_v2 = vunpack.c.l.s4 %v984_v1  ;;  %v405_v5 = vcombine.low %v985_v4, %v985_v4  ;;  %v986_v7 = vmov 0.0   ;;  %v1138_v9 = vld [vmem:[%s248_s8] sm:$0xff]  ;;  %v1140_v10 = vld [vmem:[%s248_s8 + $0x8] sm:$0xff] }
  0x46   : > { %s1255_s15 = smov (!%p309_p9, %s971_s15), 1  ;;  %v1127_v3 = vshrl.u32 %v372_v0, 7  ;;  %v326_v11 = vld [vmem:[%s257_s12] sm:$0xff]  ;;  %v327_v12 = vld [vmem:[%s257_s12 + $0x8] sm:$0xff]  ;;  %v338_v13 = vrot.slane %v1138_v9, 4  ;;  %v344_v14 = vrot.slane %v1140_v10, 4 }
  0x47   : > { %s744_s24 = sshll.u32 %s1255_s15, 3  ;;  %v408_v6 = vunpack.c.0.s8 %v407_v2  ;;  %v445_v16 = vmul.f32 0.2, %v326_v11  ;;  %s266_s15 = scalar_lea.vmem [#allocation6], %s731_s10  ;;  %v446_v21 = vmul.f32 0.2, %v327_v12 }
  0x48   : > { %s1132_s22 = scalar_lea.vmem %s1239_s3, %s744_s24  ;;  %v328_v17 = vld [vmem:[%s266_s15] sm:$0x3]  ;;  %v339_v18 = vmax.f32 %v1138_v9, %v338_v13  ;;  %v345_v19 = vmax.f32 %v1140_v10, %v344_v14  ;;  %vm1155_vm3 = vcmp.lt.s32.totalorder %v372_v0, 256  ;;  %v376_v52 = vsub.s32 0, %v1127_v3 }
  0x49   : > { %323 = vst [vmem:[%s1132_s22] sm:$0x77] %v986_v7  ;;  %v1136_v8 = vsub.s32 %v408_v6, %v1127_v3  ;;  %vm402_vm0 = vcmp.ne.s32.totalorder %v328_v17, 255  ;;  %v447_v22 = vrot.slane %v445_v16, 4  ;;  %v453_v29 = vrot.slane %v446_v21, 4 }
  0x4a   : > { %v340_v23 = vrot.slane %v339_v18, 2  ;;  %v346_v24 = vrot.slane %v345_v19, 2  ;;  %v380_v55 = vsub.s32 1, %v1127_v3  ;;  %v377_v60 = vrot.slane %v328_v17, %v376_v52 }
  0x4b   : > { %v412_v15 = vrot.slane %v405_v5, %v1136_v8  ;;  %v448_v25 = vmax.f32 %v445_v16, %v447_v22  ;;  %v454_v36 = vmax.f32 %v446_v21, %v453_v29 }
  0x4c   : > { %v341_v26 = vmax.f32 %v339_v18, %v340_v23  ;;  %v347_v27 = vmax.f32 %v345_v19, %v346_v24  ;;  %v381_v62 = vrot.slane %v328_v17, %v380_v55  ;;  %vm382_vm4 = vcmp.eq.s32.totalorder %v1127_v3, %v377_v60 }
  0x4d   : > { %v419_v20 = vrot.slane %v412_v15, %v1136_v8  ;;  %v449_v32 = vrot.slane %v448_v25, 2  ;;  %v455_v41 = vrot.slane %v454_v36, 2  ;;  %v384_v63 = vsel %vm382_vm4, %v1138_v9, 0.0 }
  0x4e   : > { %v342_v34 = vrot.slane %v341_v26, 1  ;;  %v348_v35 = vrot.slane %v347_v27, 1  ;;  %vm383_vm5 = vcmp.eq.s32.totalorder %v1127_v3, %v381_v62  ;;  %v386_v5 = vrot.slane %v384_v63, 4 }
  0x4f   : > { %vm420_vm1 = vcmp.ne.s32.totalorder %v419_v20, 0  ;;  %v450_v38 = vmax.f32 %v448_v25, %v449_v32  ;;  %v456_v45 = vmax.f32 %v454_v36, %v455_v41  ;;  %v385_v0 = vsel %vm383_vm5, %v1140_v10, 0.0 }
  0x50   : > { %vm1148_vm2 = vmand %vm402_vm0, %vm420_vm1  ;;  %v735_v30 = vld [vmem:[%s1132_s22 + $0x1] ss:$4 sm:$0x3]  ;;  %v1159_v39 = vmax.f32 %v341_v26, %v342_v34  ;;  %v1161_v40 = vmax.f32 %v347_v27, %v348_v35  ;;  %v387_v17 = vadd.f32 %v386_v5, %v384_v63 }
  0x51   : > { %v734_v31 = vsel %vm1148_vm2, 1.0, %v986_v7  ;;  %v451_v42 = vrot.slane %v450_v38, 1  ;;  %v457_v49 = vrot.slane %v456_v45, 1  ;;  %v392_v7 = vrot.slane %v385_v0, 4 }
  0x52   : > { %v538_v37 = vadd.f32 %v735_v30, %v734_v31  ;;  %v350_v43 = vsub.f32 %v1138_v9, %v1159_v39  ;;  %v351_v44 = vsub.f32 %v1140_v10, %v1161_v40  ;;  %v388_v26 = vrot.slane %v387_v17, 2 }
  0x53   : > { %v452_v46 = vmax.f32 %v450_v38, %v451_v42  ;;  %v458_v53 = vmax.f32 %v456_v45, %v457_v49  ;;  %v393_v18 = vadd.f32 %v392_v7, %v385_v0 }
  0x54   : > { %736 = vst.msk [vmem:[%s1132_s22 + $0x1] ss:$4 sm:$0x3] %vm1155_vm3, %v538_v37  ;;  %v352_v47 = vmul.f32 1.442695, %v350_v43  ;;  %v389_v41 = vadd.f32 %v388_v26, %v387_v17 }
  0x55   : > { %v354_v48 = vmul.f32 1.442695, %v351_v44  ;;  %v1170_v50 = vsub.f32 %v445_v16, %v452_v46  ;;  %v1172_v51 = vmul.f32 0.2, %v350_v43  ;;  %v1175_v54 = vmul.f32 0.2, %v351_v44 }
  0x56   : > { %813 = vpow2.f32 %v352_v47  ;;  %v1179_v57 = vsub.f32 %v446_v21, %v458_v53  ;;  %v394_v30 = vrot.slane %v393_v18, 2 }
  0x57   : > { %815 = vpow2.f32 %v354_v48  ;;  %v461_v56 = vmul.f32 1.442695, %v1170_v50  ;;  %v489_v58 = vmul.f32 1.442695, %v1172_v51  ;;  %v491_v59 = vmul.f32 1.442695, %v1175_v54 }
  0x58   : > { %v463_v61 = vmul.f32 1.442695, %v1179_v57  ;;  %v395_v43 = vadd.f32 %v394_v30, %v393_v18  ;;  %v390_v48 = vrot.slane %v389_v41, 1 }
  0x59   : > { %817 = vpow2.f32 %v461_v56 }
  0x5a   : > { %819 = vpow2.f32 %v489_v58  ;;  %v396_v52 = vrot.slane %v395_v43, 1  ;;  %v391_v56 = vadd.f32 %v390_v48, %v389_v41  ;;  %v737_v48 = vld [vmem:[%s1132_s22 + $0x2] ss:$4 sm:$0x3] }
  0x5b   : > { %821 = vpow2.f32 %v463_v61 }
  0x5c   : > { %823 = vpow2.f32 %v491_v59  ;;  %v397_v58 = vadd.f32 %v396_v52, %v395_v43  ;;  %v398_v61 = vsub.f32 %v391_v56, %v1159_v39 }
  0x5e   : > { %v399_v63 = vsub.f32 %v397_v58, %v1161_v40 }
  0x63   : > { %v814_v1 = vpop.eup %813 }
  0x64   : > { %v816_v2 = vpop.eup %815  ;;  %v356_v4 = vrot.slane %v814_v1, 4 }
  0x65   : > { %v362_v6 = vrot.slane %v816_v2, 4 }
  0x66   : > { %v1188_v11 = vpop.eup %817  ;;  %v357_v12 = vadd.f32 %v814_v1, %v356_v4 }
  0x67   : > { %v363_v13 = vadd.f32 %v816_v2, %v362_v6  ;;  %v465_v14 = vrot.slane %v1188_v11, 4  ;;  %v820_v15 = vpop.eup %819 }
  0x68   : > { %v358_v16 = vrot.slane %v357_v12, 2  ;;  %v1191_v3 = vpop.eup %821  ;;  %v493_v24 = vrot.slane %v820_v15, 4 }
  0x69   : > { %v364_v9 = vrot.slane %v363_v13, 2  ;;  %v466_v10 = vadd.f32 %v1188_v11, %v465_v14  ;;  %v824_v19 = vpop.eup %823  ;;  %v471_v21 = vrot.slane %v1191_v3, 4 }
  0x6a   : > { %v359_v20 = vadd.f32 %v358_v16, %v357_v12  ;;  %v499_v32 = vrot.slane %v824_v19, 4  ;;  %v494_v38 = vadd.f32 %v820_v15, %v493_v24 }
  0x6b   : > { %v365_v22 = vadd.f32 %v364_v9, %v363_v13  ;;  %v467_v23 = vrot.slane %v466_v10, 2  ;;  %v472_v27 = vadd.f32 %v1191_v3, %v471_v21 }
  0x6c   : > { %v360_v25 = vrot.slane %v359_v20, 1  ;;  %v500_v45 = vadd.f32 %v824_v19, %v499_v32  ;;  %v495_v47 = vrot.slane %v494_v38, 2 }
  0x6d   : > { %v366_v29 = vrot.slane %v365_v22, 1  ;;  %v468_v31 = vadd.f32 %v467_v23, %v466_v10  ;;  %v473_v35 = vrot.slane %v472_v27, 2 }
  0x6e   : > { %v361_v34 = vadd.f32 %v360_v25, %v359_v20  ;;  %v501_v53 = vrot.slane %v500_v45, 2  ;;  %v496_v55 = vadd.f32 %v495_v47, %v494_v38 }
  0x6f   : > { %v367_v36 = vadd.f32 %v366_v29, %v365_v22  ;;  %v469_v37 = vrot.slane %v468_v31, 1  ;;  %v474_v42 = vadd.f32 %v473_v35, %v472_v27 }
  0x70   : > { %825 = vlog2.f32 %v361_v34  ;;  %v502_v59 = vadd.f32 %v501_v53, %v500_v45  ;;  %v497_v60 = vrot.slane %v496_v55, 1 }
  0x71   : > { %827 = vlog2.f32 %v367_v36  ;;  %v470_v44 = vadd.f32 %v469_v37, %v468_v31  ;;  %v475_v46 = vrot.slane %v474_v42, 1 }
  0x72   : > { %v503_v0 = vrot.slane %v502_v59, 1  ;;  %v498_v5 = vadd.f32 %v497_v60, %v496_v55 }
  0x73   : > { %829 = vrcp.f32 %v470_v44  ;;  %v476_v49 = vadd.f32 %v475_v46, %v474_v42 }
  0x74   : > { %831 = vlog2.f32 %v470_v44  ;;  %v504_v14 = vadd.f32 %v503_v0, %v502_v59 }
  0x75   : > { %833 = vrcp.f32 %v476_v49 }
  0x76   : > { %835 = vlog2.f32 %v476_v49 }
  0x77   : > { %837 = vlog2.f32 %v498_v5 }
  0x78   : > { %839 = vlog2.f32 %v504_v14 }
  0x7d   : > { %v826_v62 = vpop.eup %825 }
  0x7e   : > { %v828_v1 = vpop.eup %827  ;;  %v369_v2 = vmul.f32 0.6931472, %v826_v62 }
  0x7f   : > { %v371_v4 = vmul.f32 0.6931472, %v828_v1 }
  0x80   : > { %v830_v6 = vpop.eup %829  ;;  %v400_v7 = vsub.f32 %v398_v61, %v369_v2 }
  0x81   : > { %v832_v12 = vpop.eup %831  ;;  %v401_v13 = vsub.f32 %v399_v63, %v371_v4  ;;  %v479_v18 = vmul.f32 %v830_v6, %v1188_v11  ;;  %v529_v11 = vld [vmem:[%s1132_s22] ss:$4 sm:$0x3] }
  0x82   : > { %v422_v15 = vsub.f32 0.0, %v400_v7  ;;  %v482_v16 = vmul.f32 0.6931472, %v832_v12  ;;  %v834_v17 = vpop.eup %833 }
  0x83   : > { %v423_v9 = vsub.f32 0.0, %v401_v13  ;;  %v836_v39 = vpop.eup %835  ;;  %v480_v22 = vmul.f32 %v834_v17, %v1191_v3 }
  0x84   : > { %v485_v40 = vsub.f32 %v1170_v50, %v482_v16  ;;  %v484_v19 = vmul.f32 0.6931472, %v836_v39 }
  0x85   : > { %v426_v10 = vcombine.low %v422_v15, %v423_v9 }
  0x86   : > { %v509_v20 = vsub.f32 %v485_v40, %v1172_v51  ;;  %v486_v23 = vsub.f32 %v1179_v57, %v484_v19  ;;  %v838_v57 = vpop.eup %837 }
  0x87   : > { %v433_v21 = vrot.slane %v426_v10, %v1136_v8  ;;  %v506_v37 = vmul.f32 0.6931472, %v838_v57 }
  0x88   : > { %v511_v24 = vmul.f32 %v509_v20, %v479_v18  ;;  %v510_v26 = vsub.f32 %v486_v23, %v1175_v54  ;;  %v840_v54 = vpop.eup %839 }
  0x89   : > { %v440_v25 = vrot.slane %v433_v21, %v1136_v8  ;;  %v508_v41 = vmul.f32 0.6931472, %v840_v54 }
  0x8a   : > { %v513_v27 = vrot.slane %v511_v24, 4  ;;  %v512_v29 = vmul.f32 %v510_v26, %v480_v22 }
  0x8b   : > { %v442_v50 = vsel %vm1148_vm2, %v440_v25, 0.0 }
  0x8c   : > { %v530_v30 = vadd.f32 %v529_v11, %v442_v50  ;;  %v514_v31 = vadd.f32 %v513_v27, %v511_v24  ;;  %v519_v51 = vrot.slane %v512_v29, 4 }
  0x8e   : > { %535 = vst.msk [vmem:[%s1132_s22] ss:$4 sm:$0x3] %vm1155_vm3, %v530_v30  ;;  %v515_v3 = vrot.slane %v514_v31, 2  ;;  %v520_v32 = vadd.f32 %v519_v51, %v512_v29 }
  0x90   : > { %v516_v34 = vadd.f32 %v515_v3, %v514_v31  ;;  %v521_v35 = vrot.slane %v520_v32, 2 }
  0x92   : > { %v517_v36 = vrot.slane %v516_v34, 1  ;;  %v522_v38 = vadd.f32 %v521_v35, %v520_v32 }
  0x94   : > { %v518_v28 = vadd.f32 %v517_v36, %v516_v34  ;;  %v523_v42 = vrot.slane %v522_v38, 1 }
  0x96   : > { %v524_v43 = vadd.f32 %v523_v42, %v522_v38  ;;  %v525_v44 = vadd.f32 %v518_v28, %v506_v37 }
  0x98   : > { %v526_v45 = vadd.f32 %v524_v43, %v508_v41 }
  0x9a   : > { %v544_v46 = vcombine.low %v525_v44, %v526_v45 }
  0x9c   : > { %v551_v47 = vrot.slane %v544_v46, %v1136_v8 }
  0x9e   : > { %v558_v49 = vrot.slane %v551_v47, %v1136_v8 }
  0xa0   : > { %v560_v52 = vadd.f32 %v737_v48, %v558_v49 }
  0xa2   : > { %738 = vst.msk [vmem:[%s1132_s22 + $0x2] ss:$4 sm:$0x3] %vm1155_vm3, %v560_v52 }
  0xa3 PF: > { %s19_s17 = sadd.s32 1, %s979_s17   ;;  %s1247_s12 = smov %s963_s13 }
  0xa4   : > { %p16_p7 = scmp.ge.s32.totalorder %s19_s17, 4   ;;  %s1248_s13 = smov %s967_s14 }
  0xa5   : > { %s1249_s14 = smov %s1054_s23  ;;  %s1250_s15 = smov %s975_s16 }
  0xa6   : > { %s1251_s16 = smov %s1253_s19  ;;  %18 = sbr.rel (!%p16_p7) target bundleno = 6 (0x6), region = 102 }
  0xab   :  { %591 = vsyncpa [#allocation3], 1 }
  0xac   :  { %593 = vsyncpa [#allocation3 + $0x1], 1 }
  0xad   :  { %594 = vsyncpa [#allocation5], 1 }
  0xae   :  { %596 = vsyncpa [#allocation5 + $0x1], 1 }

</bundles_post_ra>
